<compile_context>
chip_gen: v6e
topology: v6e:2x2x1
jax: 0.10.0
libtpu: 0.0.40
codegen_flags: <defaults>
</compile_context>

<pallas_src>
import jax
import jax.numpy as jnp
from jax.experimental import pallas as pl
from jax.experimental.pallas import tpu as pltpu

_LANE = 128


def _affine_kernel(scale_ref, bias_ref, x_ref, o_ref):
    """o = x * scale + bias  (scale/bias broadcast per flattened row).

    scale_ref, bias_ref : VMEM tiles (rb, 1) in the compute dtype
    x_ref, o_ref        : VMEM tiles (rb, cb)
    """
    compute_dtype = scale_ref.dtype
    x = x_ref[...].astype(compute_dtype)
    y = x * scale_ref[...] + bias_ref[...]
    o_ref[...] = y.astype(o_ref.dtype)


def _cdiv(a, b):
    return -(-a // b)


def _tpu_generation():
    try:
        kind = jax.devices()[0].device_kind.lower()
    except Exception:
        return "unknown"
    if "v5" in kind:
        return "v5e"
    if "v6" in kind:
        return "v6e"
    if "v7" in kind:
        return "v7x"
    return "unknown"


# Per-generation tiling policy: block-size target, scoped-VMEM limit to request,
# and whether the VPU executes bf16 natively.
_GEN_CONFIG = {
    # v5e: 16 MiB scoped default / 128 MiB physical; no bf16 VALU.
    "v5e": dict(target_bytes=3 << 20, vmem_limit_bytes=32 << 20, native_bf16=False),
    # v6e: 32 MiB scoped default / 128 MiB physical; bf16 VALU.
    "v6e": dict(target_bytes=6 << 20, vmem_limit_bytes=56 << 20, native_bf16=True),
    # v7x: 32 MiB scoped default / 64 MiB physical per TC; bf16 VALU; 2 TCs.
    "v7x": dict(target_bytes=5 << 20, vmem_limit_bytes=30 << 20, native_bf16=True),
    "unknown": dict(target_bytes=2 << 20, vmem_limit_bytes=32 << 20, native_bf16=False),
}


def _choose_blocks(rows, cols, x_itemsize, param_itemsize, target_bytes):
    """Pick a lane-dense (rb, cb) block whose VMEM footprint (including the
    padded (rb,1) scale/bias tiles) stays near target_bytes."""
    sub = max(8, 32 // x_itemsize)  # dtype-aware sublane multiple (8/16/32)
    # Each (rb, 1) param row pads to one full 128-lane vreg row; two params.
    param_row_bytes = 2 * _LANE * param_itemsize

    # Column (lane) block: keep full width if a minimal (sub-row) strip fits
    # the budget; otherwise split into 128-multiple chunks (the final block
    # may be partial -> masked edge stores only).
    full_row_bytes = cols * x_itemsize + param_row_bytes
    if sub * full_row_bytes <= target_bytes or cols <= _LANE:
        cb = cols
    else:
        cb = (target_bytes // (sub * x_itemsize) // _LANE) * _LANE
        cb = max(_LANE, min(cb, cols))

    # Row (sublane) block: fill the remaining budget, rounded to `sub`.
    per_row = cb * x_itemsize + param_row_bytes
    rb = target_bytes // per_row
    if rb >= rows:
        rb = rows
    else:
        rb = max(sub, (rb // sub) * sub)

    # Megacore: if the whole tensor fits a single block but is still sizeable,
    # force >= 2 parallel blocks so both v7x TensorCores get work (free on
    # single-TC v5e/v6e).
    total_bytes = rows * cols * x_itemsize
    if _cdiv(rows, rb) * _cdiv(cols, cb) == 1 and total_bytes >= (1 << 20):
        half_r = _cdiv(_cdiv(rows, 2), sub) * sub
        if half_r < rows:
            rb = half_r
        elif cols >= 2 * _LANE:
            cb = max(_LANE, _cdiv(_cdiv(cols, 2), _LANE) * _LANE)

    return int(rb), int(cb)


def normalize_image(x, mean, std):
    """Per-channel normalization of an NCHW image tensor via Pallas."""
    n, c, h, w = x.shape
    hw = h * w
    rows = n * c
    x_itemsize = jnp.dtype(x.dtype).itemsize

    gen = _tpu_generation()
    cfg = _GEN_CONFIG[gen]

    # Compute dtype: native bf16 on v6e/v7x, f32 everywhere else.
    if x.dtype == jnp.bfloat16 and cfg["native_bf16"]:
        compute_dtype = jnp.bfloat16
    else:
        compute_dtype = jnp.float32
    param_itemsize = jnp.dtype(compute_dtype).itemsize

    # Flatten to a lane-dense 2D view; contiguous NCHW -> free reshape.
    x2 = x.reshape(rows, hw)

    # Fold mean/std into a single multiply-add, one (scale, bias) per row.
    scale = 1.0 / std.astype(jnp.float32)                       # (C,)
    bias = -mean.astype(jnp.float32) * scale                    # (C,)
    scale_rows = jnp.tile(scale, n).reshape(rows, 1).astype(compute_dtype)
    bias_rows = jnp.tile(bias, n).reshape(rows, 1).astype(compute_dtype)

    rb, cb = _choose_blocks(rows, hw, x_itemsize, param_itemsize,
                            cfg["target_bytes"])
    grid = (_cdiv(rows, rb), _cdiv(hw, cb))

    out2 = pl.pallas_call(
        _affine_kernel,
        out_shape=jax.ShapeDtypeStruct((rows, hw), x.dtype),
        grid_spec=pl.GridSpec(
            grid=grid,
            in_specs=[
                pl.BlockSpec((rb, 1), lambda i, j: (i, 0)),     # scale
                pl.BlockSpec((rb, 1), lambda i, j: (i, 0)),     # bias
                pl.BlockSpec((rb, cb), lambda i, j: (i, j)),    # x
            ],
            out_specs=pl.BlockSpec((rb, cb), lambda i, j: (i, j)),
        ),
        compiler_params=pltpu.CompilerParams(
            dimension_semantics=("parallel", "parallel"),
            vmem_limit_bytes=cfg["vmem_limit_bytes"],
        ),
        cost_estimate=pl.CostEstimate(
            flops=2 * rows * hw,
            transcendentals=0,
            bytes_accessed=2 * rows * hw * x_itemsize + 2 * rows * param_itemsize,
        ),
    )(scale_rows, bias_rows, x2)

    return out2.reshape(n, c, h, w)


class OnlyImageAugmentationWrapper:
    """JAX/Pallas equivalent of the PyTorch wrapper.

    forward(x, *y) -> (aug_fn(x), *y)
    """

    def __init__(self, aug_fn):
        self.aug_fn = aug_fn

    def __call__(self, *batch):
        x, *y = batch
        x = self.aug_fn(x)
        return (x, *y)


if __name__ == "__main__":
    key = jax.random.PRNGKey(0)
    kx, ky, kz = jax.random.split(key, 3)

    # Small NCHW image batch + an extra "label" tensor that must pass through.
    N, C, H, W = 2, 4, 16, 16
    x = jax.random.normal(kx, (N, C, H, W), dtype=jnp.float32)
    labels = jax.random.randint(ky, (N,), 0, 10, dtype=jnp.int32)

    # Deterministic per-channel augmentation parameters (synthetic "aug_module").
    # TODO(synk): the PyTorch wrapper is agnostic to the wrapped aug_module;
    # stochastic augmentations would need pltpu.prng_* and are not modeled here.
    mean = jnp.linspace(-0.5, 0.5, C, dtype=jnp.float32)
    std = jnp.linspace(0.5, 1.5, C, dtype=jnp.float32)

    aug_fn = lambda img: normalize_image(img, mean, std)
    wrapper = OnlyImageAugmentationWrapper(aug_fn)

    out_x, out_labels = wrapper(x, labels)
    out_x = jax.block_until_ready(out_x)
    out_labels = jax.block_until_ready(out_labels)

    # Correctness check against plain-JAX reference.
    ref = (x - mean[None, :, None, None]) / std[None, :, None, None]
    assert out_x.shape == x.shape and out_x.dtype == x.dtype
    assert jnp.allclose(out_x, ref, atol=1e-5, rtol=1e-5)
    # y must be passed through untouched.
    assert jnp.array_equal(out_labels, labels)

    # Non-128-multiple spatial width (edge/partial column block path).
    H2, W2 = 12, 12
    x_odd = jax.random.normal(kz, (N, C, H2, W2), dtype=jnp.float32)
    out_odd = jax.block_until_ready(wrapper(x_odd, labels)[0])
    ref_odd = (x_odd - mean[None, :, None, None]) / std[None, :, None, None]
    assert jnp.allclose(out_odd, ref_odd, atol=1e-5, rtol=1e-5)

    # Mixed-dtype path (native bf16 compute on v6e/v7x, f32 compute elsewhere).
    x_bf16 = x.astype(jnp.bfloat16)
    out_bf16 = jax.block_until_ready(wrapper(x_bf16, labels)[0])
    assert out_bf16.dtype == jnp.bfloat16
    ref_bf16 = (x_bf16.astype(jnp.float32) - mean[None, :, None, None]) / std[
        None, :, None, None
    ]
    assert jnp.allclose(out_bf16.astype(jnp.float32), ref_bf16, atol=5e-2, rtol=5e-2)

    print("KERNEL_OK")
</pallas_src>

<mosaic_0001>
module attributes {stable_mosaic.version = 11 : i64} {
  func.func @_affine_kernel(%arg0: i32, %arg1: i32, %arg2: memref<8x1xf32, #tpu.memory_space<vmem>>, %arg3: memref<8x1xf32, #tpu.memory_space<vmem>>, %arg4: memref<8x256xf32, #tpu.memory_space<vmem>>, %arg5: memref<8x256xf32, #tpu.memory_space<vmem>>) attributes {dimension_semantics = [#tpu.dimension_semantics<parallel>, #tpu.dimension_semantics<parallel>], iteration_bounds = array<i64: 1, 1>, scalar_prefetch = 0 : i64, scratch_operands = 0 : i64, tpu.core_type = #tpu.core_type<tc>, window_params = [{transform_indices = @transform_0, window_bounds = array<i64: 8, 1>}, {transform_indices = @transform_1, window_bounds = array<i64: 8, 1>}, {transform_indices = @transform_2, window_bounds = array<i64: 8, 256>}, {transform_indices = @transform_3, window_bounds = array<i64: 8, 256>}]} {
    %c0 = arith.constant 0 : index
    %c0_0 = arith.constant 0 : index
    %0 = vector.load %arg4[%c0, %c0_0] : memref<8x256xf32, #tpu.memory_space<vmem>>, vector<8x256xf32>
    %c0_1 = arith.constant 0 : index
    %c0_2 = arith.constant 0 : index
    %1 = vector.load %arg2[%c0_1, %c0_2] : memref<8x1xf32, #tpu.memory_space<vmem>>, vector<8x1xf32>
    %2 = vector.broadcast %1 : vector<8x1xf32> to vector<8x256xf32>
    %3 = arith.mulf %0, %2 : vector<8x256xf32>
    %c0_3 = arith.constant 0 : index
    %c0_4 = arith.constant 0 : index
    %4 = vector.load %arg3[%c0_3, %c0_4] : memref<8x1xf32, #tpu.memory_space<vmem>>, vector<8x1xf32>
    %5 = vector.broadcast %4 : vector<8x1xf32> to vector<8x256xf32>
    %6 = arith.addf %3, %5 : vector<8x256xf32>
    %c0_5 = arith.constant 0 : index
    %c0_6 = arith.constant 0 : index
    %7 = vector.load %arg5[%c0_5, %c0_6] : memref<8x256xf32, #tpu.memory_space<vmem>>, vector<8x256xf32>
    tpu.vector_store %arg5[%c0_5, %c0_6], %6 {strides = array<i32>} : memref<8x256xf32, #tpu.memory_space<vmem>>, vector<8x256xf32>,
    return
  }
  func.func @transform_0(%arg0: i32, %arg1: i32) -> (i32, i32) {
    %c0_i32 = arith.constant 0 : i32
    %c0_i32_0 = arith.constant 0 : i32
    return %arg0, %c0_i32 : i32, i32
  }
  func.func @transform_1(%arg0: i32, %arg1: i32) -> (i32, i32) {
    %c0_i32 = arith.constant 0 : i32
    %c0_i32_0 = arith.constant 0 : i32
    return %arg0, %c0_i32 : i32, i32
  }
  func.func @transform_2(%arg0: i32, %arg1: i32) -> (i32, i32) {
    %c0_i32 = arith.constant 0 : i32
    return %arg0, %arg1 : i32, i32
  }
  func.func @transform_3(%arg0: i32, %arg1: i32) -> (i32, i32) {
    %c0_i32 = arith.constant 0 : i32
    return %arg0, %arg1 : i32, i32
  }
}

</mosaic_0001>

<bundles_post_ra>
// kernel: tpu_custom_call.1
= control target key start
LH: loop header
LB: loop body
LE: loop exit
PB: predicated region body
PF: predicated region fallthrough
CT: control target
= control target key end

     0   :  { %v74_v1 = vmov 0   ;;  %s111_s0 = inlined_call_operand.vmem [shape: f32[8,1], index: 0, kind: input, shape index: {}]   ;;  %s112_s1 = inlined_call_operand.vmem [shape: f32[8,1], index: 1, kind: input, shape index: {}]   ;;  %s113_s2 = inlined_call_operand.vmem [shape: f32[8,256], index: 2, kind: input, shape index: {}]   ;;  %s114_s3 = inlined_call_operand.hbm [shape: f32[8,256], index: 3, kind: output, shape index: {}]  }
   0x1   :  { %v17_v0 = vld [vmem:[%s111_s0] sm:$0xff]  ;;  %51 = vset.pattern.permute.xlu0 %v74_v1 }
   0x2   :  { %8 = vsyncpa [#allocation3], 0  ;;  %20 = vperm.xlu0 %51, %v17_v0   ;;  %v25_v2 = vld [vmem:[%s112_s1] sm:$0xff]  ;;  %v16_v5 = vld [vmem:[%s113_s2 + $0x8] sm:$0xff]  ;;  %s75_s20 = smov [#allocation2]  }
   0x3   :  { %v15_v4 = vld [vmem:[%s113_s2] sm:$0xff]  ;;  %s41_s0 = sshll.u32 %s75_s20, 4  ;;  %s42_s0 = int_to_ptr.vmem [resolvable:$true] %s41_s0 }
   0x4   :  { %s52_s1 = scalar_lea.vmem %s42_s0, 256  ;;  %p57_p1 = scmp.lt.s32.totalorder %s42_s0, %s42_s0 }
   0x5   :  { %p53_p0 = scmp.ne.s32.totalorder %s42_s0, %s52_s1  ;;  %p58_p2 = scmp.lt.s32.totalorder %s52_s1, %s52_s1 }
   0x6   :  { %28 = vperm.xlu0 %51, %v25_v2  }
   0x7   :  { %p59_p3 = por %p58_p2, %p57_p1 }
   0x9   :  { %p60_p4 = pnand %p59_p3, %p53_p0 }
  0x7d   :  { %v21_v3 = vpop.permute.xlu0 %20 }
  0x7e   :  { %v23_v6 = vmul.f32 %v21_v3, %v15_v4  ;;  %v24_v7 = vmul.f32 %v21_v3, %v16_v5 }
  0x81   :  { %v29_v8 = vpop.permute.xlu0 %28 }
  0x82   :  { %v31_v9 = vadd.f32 %v29_v8, %v23_v6  ;;  %v32_v10 = vadd.f32 %v29_v8, %v24_v7 }
  0x84   :  { %33 = vst [vmem:[#allocation2] sm:$0xff] %v31_v9  ;;  %34 = vst [vmem:[#allocation2 + $0x8] sm:$0xff] %v32_v10 }
  0x85   :  { %63 = shalt.err (!%p60_p4)
}
  0x86   :  { %44 = dma.vmem_to_hbm [thread:$0]  %s42_s0, 256, %s114_s3, [#allocation3]  }
  0x87   :  { %72 = dma.done.wait [#allocation3], 256  }
  0x88   :  { %73 = vsyncadd [#allocation3], 4294967040 }
  0x89   :  { %48 = vsyncpa [#allocation3], 1 }

</bundles_post_ra>
